<compile_context>
chip_gen: v5e
topology: v5e:2x2
jax: 0.10.0
libtpu: 0.0.40
codegen_flags: <defaults>
</compile_context>

<pallas_src>
import functools

import jax
import jax.numpy as jnp
from jax import lax
from jax.experimental import pallas as pl
from jax.experimental.pallas import tpu as pltpu

LN_EPS = 1e-5  # torch.nn.LayerNorm default


def _round_up(a: int, m: int) -> int:
    return (a + m - 1) // m * m


def _layer_norm(x, gamma, beta, d_real: int, d_pad: int):
    """LayerNorm over the real feature width (biased var, eps inside rsqrt)."""
    inv_d = 1.0 / d_real
    mean = jnp.sum(x, axis=-1, keepdims=True) * inv_d
    xc = x - mean
    if d_real != d_pad:
        lane = lax.broadcasted_iota(jnp.int32, x.shape, dimension=x.ndim - 1)
        xc = jnp.where(lane < d_real, xc, 0.0)
    var = jnp.sum(xc * xc, axis=-1, keepdims=True) * inv_d
    return xc * lax.rsqrt(var + LN_EPS) * gamma + beta


# ----------------------------- resident path --------------------------------
def _encoder_resident_kernel(x_ref, w_ref, b_ref, gamma_ref, beta_ref, o_ref,
                             *, n_layers: int, d_real: int):
    # x_ref:     (TM, Dp)     activation row tile (bf16 or f32 I/O)
    # w_ref:     (N, Dp, Dp)  bf16 stacked weights, fully VMEM-resident
    # b_ref:     (N, 1, Dp)   f32 stacked biases (leading-dim indexable)
    # gamma/beta:(1, Dp)      f32 LayerNorm params
    x = x_ref[...].astype(jnp.float32)            # residual stream in f32
    d_pad = x.shape[-1]

    def layer_body(i, x):
        # bf16 MXU inputs, f32 accumulation; bias/ReLU/residual on the VPU in f32.
        h = jnp.dot(x.astype(jnp.bfloat16), w_ref[i],
                    preferred_element_type=jnp.float32) + b_ref[i]
        return x + jnp.maximum(h, 0.0)

    if n_layers <= 8:
        for i in range(n_layers):                 # static unroll: flat body
            x = layer_body(i, x)
    else:
        x = lax.fori_loop(0, n_layers, layer_body, x, unroll=2)

    o_ref[...] = _layer_norm(x, gamma_ref[...], beta_ref[...],
                             d_real, d_pad).astype(o_ref.dtype)


# ----------------------------- streamed path --------------------------------
def _encoder_streamed_kernel(x_ref, w_ref, b_ref, gamma_ref, beta_ref, o_ref,
                             acc_ref, *, n_layers: int, d_real: int):
    # Grid = (row_tiles, n_layers); weights/biases arrive one layer per step
    # (double-buffered by the pipeline), the activation tile is carried in
    # the f32 VMEM scratch `acc_ref` across the layer axis.
    l = pl.program_id(1)

    @pl.when(l == 0)
    def _():
        acc_ref[...] = x_ref[...].astype(jnp.float32)

    x = acc_ref[...]
    h = jnp.dot(x.astype(jnp.bfloat16), w_ref[0],
                preferred_element_type=jnp.float32) + b_ref[...]
    x = x + jnp.maximum(h, 0.0)
    acc_ref[...] = x

    @pl.when(l == n_layers - 1)
    def _():
        d_pad = x.shape[-1]
        o_ref[...] = _layer_norm(x, gamma_ref[...], beta_ref[...],
                                 d_real, d_pad).astype(o_ref.dtype)


# ------------------------------- wrapper -------------------------------------
def encoder_forward(x, w_stack, b_stack, gamma, beta, *,
                    row_tile: int = 512, io_dtype=None,
                    force_streamed: bool = False):
    """x: (B, S, D) -> (B, S, D) in `io_dtype`.  w_stack: (N, D, D), b_stack: (N, D).

    io_dtype=None auto-selects bf16 activation I/O in the DMA-bound regime
    (small N*D), f32 otherwise.
    """
    B, S, D = x.shape
    N = w_stack.shape[0]
    assert w_stack.shape == (N, D, D) and b_stack.shape == (N, D)
    assert gamma.shape == (D,) and beta.shape == (D,)

    rows = B * S
    Dp = _round_up(D, 128)                        # lane-dense feature dim

    # Row tile: large (feeds the MXU, amortizes ~0.35us/step grid overhead,
    # keeps the streamed path compute-bound), 16-row aligned, padded not
    # asserted.
    tile = min(max(int(row_tile), 16), _round_up(rows, 16))
    tile = _round_up(tile, 16)
    rows_pad = _round_up(rows, tile)
    n_tiles = rows_pad // tile

    # Activation I/O dtype: FLOPs per activation-I/O byte ~ N*Dp/4; below the
    # HBM roofline (~300-650 FLOPs/B across v5e/v6e/v7x) the row-tile DMA
    # dominates, so ship activations in bf16.
    if io_dtype is None:
        io_dtype = jnp.bfloat16 if (N * Dp < 1200 or x.dtype == jnp.bfloat16) \
            else jnp.float32
    io_bytes = jnp.dtype(io_dtype).itemsize

    # ---- host-side layout: flatten rows, pad rows & lanes, cast weights ----
    x2d = x.reshape(rows, D).astype(io_dtype)
    if rows_pad != rows or Dp != D:
        x2d = jnp.pad(x2d, ((0, rows_pad - rows), (0, Dp - D)))
    w, b, g, be = w_stack, b_stack, gamma, beta
    if Dp != D:
        w = jnp.pad(w, ((0, 0), (0, Dp - D), (0, Dp - D)))
        b = jnp.pad(b, ((0, 0), (0, Dp - D)))
        g = jnp.pad(g, (0, Dp - D))
        be = jnp.pad(be, (0, Dp - D))
    w = w.astype(jnp.bfloat16)                    # halves weight DMA / VMEM
    b = b.astype(jnp.float32)                     # (N, Dp)
    g = g.reshape(1, Dp).astype(jnp.float32)
    be = be.reshape(1, Dp).astype(jnp.float32)

    # ---- generation-aware VMEM budget (per TensorCore on v7x megacore) -----
    try:
        vmem_cap = int(pltpu.get_tpu_info().vmem_capacity_bytes)
    except Exception:                             # pragma: no cover
        vmem_cap = 64 << 20                       # conservative fallback
    usable_cap = max(vmem_cap - (8 << 20), 32 << 20)   # headroom for internals

    io_tiles = 2 * 2 * tile * Dp * io_bytes       # in + out, double-buffered
    f32_work = 6 * tile * Dp * 4                  # residual + matmul temps
    gb_bytes = 2 * 2 * 8 * Dp * 4                 # gamma/beta (sublane-padded)

    res_w = N * Dp * Dp * 2                       # bf16 weight stack
    res_b = N * 8 * Dp * 4                        # (1,Dp) slabs pad to 8 sublanes
    res_est_1buf = res_w + res_b + gb_bytes + io_tiles + f32_work
    res_est_2buf = 2 * (res_w + res_b) + gb_bytes + io_tiles + f32_work

    strm_est = (2 * Dp * Dp * 2 + 2 * 8 * Dp * 4 + gb_bytes
                + io_tiles + f32_work + tile * Dp * 4)

    kern_res = functools.partial(_encoder_resident_kernel, n_layers=N, d_real=D)
    kern_strm = functools.partial(_encoder_streamed_kernel, n_layers=N, d_real=D)

    def _limit(est):
        return int(min(max(est + (8 << 20), 32 << 20), usable_cap))

    def call_resident(single_buffer_weights: bool):
        spec_kw = {}
        if single_buffer_weights:
            # Constant index_map => no re-DMA between grid steps anyway; one
            # buffer halves resident weight VMEM at zero perf cost.
            spec_kw = dict(pipeline_mode=pl.Buffered(1))
        est = res_est_1buf if single_buffer_weights else res_est_2buf
        return pl.pallas_call(
            kern_res,
            out_shape=jax.ShapeDtypeStruct((rows_pad, Dp), io_dtype),
            grid_spec=pltpu.PrefetchScalarGridSpec(
                num_scalar_prefetch=0,
                grid=(n_tiles,),
                in_specs=[
                    pl.BlockSpec((tile, Dp), lambda i: (i, 0)),            # x tile
                    pl.BlockSpec((N, Dp, Dp), lambda i: (0, 0, 0), **spec_kw),
                    pl.BlockSpec((N, 1, Dp), lambda i: (0, 0, 0), **spec_kw),
                    pl.BlockSpec((1, Dp), lambda i: (0, 0)),               # gamma
                    pl.BlockSpec((1, Dp), lambda i: (0, 0)),               # beta
                ],
                out_specs=pl.BlockSpec((tile, Dp), lambda i: (i, 0)),
            ),
            compiler_params=pltpu.CompilerParams(
                dimension_semantics=("parallel",),
                vmem_limit_bytes=_limit(est),
            ),
        )(x2d, w, b.reshape(N, 1, Dp), g, be)

    def call_streamed():
        return pl.pallas_call(
            kern_strm,
            out_shape=jax.ShapeDtypeStruct((rows_pad, Dp), io_dtype),
            grid_spec=pltpu.PrefetchScalarGridSpec(
                num_scalar_prefetch=0,
                grid=(n_tiles, N),
                in_specs=[
                    pl.BlockSpec((tile, Dp), lambda i, l: (i, 0)),         # x tile
                    pl.BlockSpec((1, Dp, Dp), lambda i, l: (l, 0, 0)),     # W_l
                    pl.BlockSpec((1, Dp), lambda i, l: (l, 0)),            # b_l
                    pl.BlockSpec((1, Dp), lambda i, l: (0, 0)),            # gamma
                    pl.BlockSpec((1, Dp), lambda i, l: (0, 0)),            # beta
                ],
                out_specs=pl.BlockSpec((tile, Dp), lambda i, l: (i, 0)),
                scratch_shapes=[pltpu.VMEM((tile, Dp), jnp.float32)],
            ),
            compiler_params=pltpu.CompilerParams(
                dimension_semantics=("parallel", "arbitrary"),
                vmem_limit_bytes=_limit(strm_est),
            ),
        )(x2d, w, b, g, be)

    use_resident = (not force_streamed) and (res_est_1buf <= usable_cap)

    if use_resident:
        out2d = None
        if hasattr(pl, "Buffered"):
            try:
                # Eager pallas_call compiles at call time, so an unsupported
                # pipeline_mode surfaces here and we can fall back cleanly.
                out2d = call_resident(True)
            except Exception:
                out2d = None
        if out2d is None:
            if res_est_2buf <= usable_cap:
                out2d = call_resident(False)
            else:
                out2d = call_streamed()
    else:
        out2d = call_streamed()

    return out2d[:rows, :D].reshape(B, S, D)


# ------------------------------ references -----------------------------------
def _reference_bf16(x, w_stack, b_stack, gamma, beta):
    """Pure-JAX reference mirroring the kernel's bf16-matmul / f32-elsewhere math."""
    y = x.astype(jnp.float32)
    for i in range(w_stack.shape[0]):
        h = jnp.einsum("bsd,de->bse", y.astype(jnp.bfloat16),
                       w_stack[i].astype(jnp.bfloat16),
                       preferred_element_type=jnp.float32) + b_stack[i]
        y = y + jnp.maximum(h, 0.0)
    mean = jnp.mean(y, axis=-1, keepdims=True)
    var = jnp.mean((y - mean) ** 2, axis=-1, keepdims=True)
    return (y - mean) * lax.rsqrt(var + LN_EPS) * gamma + beta


def _reference_f32(x, w_stack, b_stack, gamma, beta):
    """Full-f32 reference of the same forward (looser comparison)."""
    y = x.astype(jnp.float32)
    for i in range(w_stack.shape[0]):
        h = jnp.einsum("bsd,de->bse", y, w_stack[i],
                       preferred_element_type=jnp.float32) + b_stack[i]
        y = y + jnp.maximum(h, 0.0)
    mean = jnp.mean(y, axis=-1, keepdims=True)
    var = jnp.mean((y - mean) ** 2, axis=-1, keepdims=True)
    return (y - mean) * lax.rsqrt(var + LN_EPS) * gamma + beta


if __name__ == "__main__":
    key = jax.random.PRNGKey(0)
    k1, k2, k3, k4, k5, k6, k7, k8 = jax.random.split(key, 8)

    # ---- config 1: resident-weight path, auto (bf16) activation I/O --------
    B, S, D, N = 2, 8, 128, 2
    x = jax.random.normal(k1, (B, S, D), dtype=jnp.float32)
    w_stack = 0.05 * jax.random.normal(k2, (N, D, D), dtype=jnp.float32)
    b_stack = 0.01 * jax.random.normal(k3, (N, D), dtype=jnp.float32)
    gamma = jnp.ones((D,), jnp.float32)     # torch LayerNorm default weight
    beta = jnp.zeros((D,), jnp.float32)     # torch LayerNorm default bias

    out = jax.block_until_ready(encoder_forward(x, w_stack, b_stack, gamma, beta))
    assert out.shape == (B, S, D)
    # Tight check: the reference sees the same bf16-rounded input/output I/O.
    x_io = x.astype(jnp.bfloat16).astype(jnp.float32)
    ref1 = _reference_bf16(x_io, w_stack, b_stack, gamma, beta)
    ref1 = ref1.astype(out.dtype).astype(jnp.float32)
    assert jnp.allclose(out.astype(jnp.float32), ref1, atol=2e-2, rtol=2e-2)

    # ---- config 2: streamed-weight path, f32 I/O, D not a multiple of 128 --
    B2, S2, D2, N2 = 2, 24, 96, 3
    x2 = jax.random.normal(k4, (B2, S2, D2), dtype=jnp.float32)
    w2 = 0.05 * jax.random.normal(k5, (N2, D2, D2), dtype=jnp.float32)
    b2 = 0.01 * jax.random.normal(k6, (N2, D2), dtype=jnp.float32)
    g2 = 1.0 + 0.1 * jax.random.normal(k7, (D2,), dtype=jnp.float32)
    be2 = 0.1 * jax.random.normal(k8, (D2,), dtype=jnp.float32)

    out2 = jax.block_until_ready(
        encoder_forward(x2, w2, b2, g2, be2,
                        io_dtype=jnp.float32, force_streamed=True))
    assert out2.shape == (B2, S2, D2)
    ref2_bf16 = _reference_bf16(x2, w2, b2, g2, be2)
    ref2_f32 = _reference_f32(x2, w2, b2, g2, be2)
    # Tight check vs. a reference doing the same bf16-input / f32-accum matmul.
    assert jnp.allclose(out2, ref2_bf16, atol=2e-3, rtol=2e-3)
    # Loose check vs. the pure-f32 math (bf16 rounding only).
    assert jnp.allclose(out2, ref2_f32, atol=5e-2, rtol=5e-2)

    print("KERNEL_OK")
</pallas_src>

<mosaic_0001>
module attributes {stable_mosaic.version = 11 : i64} {
  func.func @_encoder_resident_kernel(%arg0: i32, %arg1: memref<16x128xbf16, #tpu.memory_space<vmem>>, %arg2: memref<2x128x128xbf16, #tpu.memory_space<vmem>>, %arg3: memref<2x1x128xf32, #tpu.memory_space<vmem>>, %arg4: memref<1x128xf32, #tpu.memory_space<vmem>>, %arg5: memref<1x128xf32, #tpu.memory_space<vmem>>, %arg6: memref<16x128xbf16, #tpu.memory_space<vmem>>) attributes {dimension_semantics = [#tpu.dimension_semantics<parallel>], iteration_bounds = array<i64: 1>, scalar_prefetch = 0 : i64, scratch_operands = 0 : i64, tpu.core_type = #tpu.core_type<tc>, window_params = [{transform_indices = @transform_0, window_bounds = array<i64: 16, 128>}, {pipeline_mode = #tpu.pipeline_mode<synchronous>, transform_indices = @transform_1, window_bounds = array<i64: 2, 128, 128>}, {pipeline_mode = #tpu.pipeline_mode<synchronous>, transform_indices = @transform_2, window_bounds = array<i64: 2, 1, 128>}, {pipeline_mode = #tpu.pipeline_mode<synchronous>, transform_indices = @transform_3, window_bounds = array<i64: 1, 128>}, {pipeline_mode = #tpu.pipeline_mode<synchronous>, transform_indices = @transform_4, window_bounds = array<i64: 1, 128>}, {transform_indices = @transform_5, window_bounds = array<i64: 16, 128>}]} {
    %c0 = arith.constant 0 : index
    %c0_0 = arith.constant 0 : index
    %0 = vector.load %arg1[%c0, %c0_0] : memref<16x128xbf16, #tpu.memory_space<vmem>>, vector<16x128xbf16>
    %1 = arith.extf %0 : vector<16x128xbf16> to vector<16x128xf32>
    %2 = arith.truncf %1 : vector<16x128xf32> to vector<16x128xbf16>
    %c0_1 = arith.constant 0 : index
    %c0_2 = arith.constant 0 : index
    %c0_3 = arith.constant 0 : index
    %3 = vector.load %arg2[%c0_1, %c0_2, %c0_3] : memref<2x128x128xbf16, #tpu.memory_space<vmem>>, vector<1x128x128xbf16>
    %4 = vector.shape_cast %3 : vector<1x128x128xbf16> to vector<128x128xbf16>
    %cst = arith.constant dense<0.000000e+00> : vector<16x128xf32>
    %5 = tpu.matmul %2, %4, %cst {dimension_numbers = #tpu.dot_dimension_numbers<[1], [0], [0], [1], [0, 0, 1, 1], [], []>} : vector<16x128xbf16>, vector<128x128xbf16>, vector<16x128xf32> -> vector<16x128xf32>
    %c0_4 = arith.constant 0 : index
    %c0_5 = arith.constant 0 : index
    %c0_6 = arith.constant 0 : index
    %6 = vector.load %arg3[%c0_4, %c0_5, %c0_6] : memref<2x1x128xf32, #tpu.memory_space<vmem>>, vector<1x1x128xf32>
    %7 = vector.shape_cast %6 : vector<1x1x128xf32> to vector<1x128xf32>
    %8 = vector.broadcast %7 : vector<1x128xf32> to vector<16x128xf32>
    %9 = arith.addf %5, %8 : vector<16x128xf32>
    %cst_7 = arith.constant 0.000000e+00 : f32
    %10 = vector.broadcast %cst_7 : f32 to vector<16x128xf32>
    %11 = arith.maximumf %9, %10 : vector<16x128xf32>
    %12 = arith.addf %1, %11 : vector<16x128xf32>
    %13 = arith.truncf %12 : vector<16x128xf32> to vector<16x128xbf16>
    %c1 = arith.constant 1 : index
    %c0_8 = arith.constant 0 : index
    %c0_9 = arith.constant 0 : index
    %14 = vector.load %arg2[%c1, %c0_8, %c0_9] : memref<2x128x128xbf16, #tpu.memory_space<vmem>>, vector<1x128x128xbf16>
    %15 = vector.shape_cast %14 : vector<1x128x128xbf16> to vector<128x128xbf16>
    %cst_10 = arith.constant dense<0.000000e+00> : vector<16x128xf32>
    %16 = tpu.matmul %13, %15, %cst_10 {dimension_numbers = #tpu.dot_dimension_numbers<[1], [0], [0], [1], [0, 0, 1, 1], [], []>} : vector<16x128xbf16>, vector<128x128xbf16>, vector<16x128xf32> -> vector<16x128xf32>
    %c1_11 = arith.constant 1 : index
    %c0_12 = arith.constant 0 : index
    %c0_13 = arith.constant 0 : index
    %17 = vector.load %arg3[%c1_11, %c0_12, %c0_13] : memref<2x1x128xf32, #tpu.memory_space<vmem>>, vector<1x1x128xf32>
    %18 = vector.shape_cast %17 : vector<1x1x128xf32> to vector<1x128xf32>
    %19 = vector.broadcast %18 : vector<1x128xf32> to vector<16x128xf32>
    %20 = arith.addf %16, %19 : vector<16x128xf32>
    %cst_14 = arith.constant 0.000000e+00 : f32
    %21 = vector.broadcast %cst_14 : f32 to vector<16x128xf32>
    %22 = arith.maximumf %20, %21 : vector<16x128xf32>
    %23 = arith.addf %12, %22 : vector<16x128xf32>
    %c0_15 = arith.constant 0 : index
    %c0_16 = arith.constant 0 : index
    %24 = vector.load %arg4[%c0_15, %c0_16] : memref<1x128xf32, #tpu.memory_space<vmem>>, vector<1x128xf32>
    %c0_17 = arith.constant 0 : index
    %c0_18 = arith.constant 0 : index
    %25 = vector.load %arg5[%c0_17, %c0_18] : memref<1x128xf32, #tpu.memory_space<vmem>>, vector<1x128xf32>
    %cst_19 = arith.constant dense<0.000000e+00> : vector<16xf32>
    %26 = vector.multi_reduction <add>, %23, %cst_19 [1] : vector<16x128xf32> to vector<16xf32>
    %27 = vector.shape_cast %26 : vector<16xf32> to vector<16x1xf32>
    %cst_20 = arith.constant 7.812500e-03 : f32
    %28 = vector.broadcast %cst_20 : f32 to vector<16x1xf32>
    %29 = arith.mulf %27, %28 : vector<16x1xf32>
    %30 = vector.broadcast %29 : vector<16x1xf32> to vector<16x128xf32>
    %31 = arith.subf %23, %30 : vector<16x128xf32>
    %32 = arith.mulf %31, %31 : vector<16x128xf32>
    %cst_21 = arith.constant dense<0.000000e+00> : vector<16xf32>
    %33 = vector.multi_reduction <add>, %32, %cst_21 [1] : vector<16x128xf32> to vector<16xf32>
    %34 = vector.shape_cast %33 : vector<16xf32> to vector<16x1xf32>
    %cst_22 = arith.constant 7.812500e-03 : f32
    %35 = vector.broadcast %cst_22 : f32 to vector<16x1xf32>
    %36 = arith.mulf %34, %35 : vector<16x1xf32>
    %cst_23 = arith.constant 9.99999974E-6 : f32
    %37 = vector.broadcast %cst_23 : f32 to vector<16x1xf32>
    %38 = arith.addf %36, %37 : vector<16x1xf32>
    %39 = math.rsqrt %38 : vector<16x1xf32>
    %40 = vector.broadcast %39 : vector<16x1xf32> to vector<16x128xf32>
    %41 = arith.mulf %31, %40 : vector<16x128xf32>
    %42 = vector.broadcast %24 : vector<1x128xf32> to vector<16x128xf32>
    %43 = arith.mulf %41, %42 : vector<16x128xf32>
    %44 = vector.broadcast %25 : vector<1x128xf32> to vector<16x128xf32>
    %45 = arith.addf %43, %44 : vector<16x128xf32>
    %46 = arith.truncf %45 : vector<16x128xf32> to vector<16x128xbf16>
    %c0_24 = arith.constant 0 : index
    %c0_25 = arith.constant 0 : index
    %47 = vector.load %arg6[%c0_24, %c0_25] : memref<16x128xbf16, #tpu.memory_space<vmem>>, vector<16x128xbf16>
    tpu.vector_store %arg6[%c0_24, %c0_25], %46 {strides = array<i32>} : memref<16x128xbf16, #tpu.memory_space<vmem>>, vector<16x128xbf16>,
    return
  }
  func.func @transform_0(%arg0: i32) -> (i32, i32) {
    %c0_i32 = arith.constant 0 : i32
    %c0_i32_0 = arith.constant 0 : i32
    return %arg0, %c0_i32 : i32, i32
  }
  func.func @transform_1(%arg0: i32) -> (i32, i32, i32) {
    %c0_i32 = arith.constant 0 : i32
    %c0_i32_0 = arith.constant 0 : i32
    %c0_i32_1 = arith.constant 0 : i32
    %c0_i32_2 = arith.constant 0 : i32
    return %c0_i32, %c0_i32_0, %c0_i32_1 : i32, i32, i32
  }
  func.func @transform_2(%arg0: i32) -> (i32, i32, i32) {
    %c0_i32 = arith.constant 0 : i32
    %c0_i32_0 = arith.constant 0 : i32
    %c0_i32_1 = arith.constant 0 : i32
    %c0_i32_2 = arith.constant 0 : i32
    return %c0_i32, %c0_i32_0, %c0_i32_1 : i32, i32, i32
  }
  func.func @transform_3(%arg0: i32) -> (i32, i32) {
    %c0_i32 = arith.constant 0 : i32
    %c0_i32_0 = arith.constant 0 : i32
    %c0_i32_1 = arith.constant 0 : i32
    return %c0_i32, %c0_i32_0 : i32, i32
  }
  func.func @transform_4(%arg0: i32) -> (i32, i32) {
    %c0_i32 = arith.constant 0 : i32
    %c0_i32_0 = arith.constant 0 : i32
    %c0_i32_1 = arith.constant 0 : i32
    return %c0_i32, %c0_i32_0 : i32, i32
  }
  func.func @transform_5(%arg0: i32) -> (i32, i32) {
    %c0_i32 = arith.constant 0 : i32
    %c0_i32_0 = arith.constant 0 : i32
    return %arg0, %c0_i32 : i32, i32
  }
}

module attributes {stable_mosaic.version = 11 : i64} {
  func.func @_encoder_resident_kernel(%arg0: i32, %arg1: memref<16x128xbf16, #tpu.memory_space<vmem>>, %arg2: memref<2x128x128xbf16, #tpu.memory_space<vmem>>, %arg3: memref<2x1x128xf32, #tpu.memory_space<vmem>>, %arg4: memref<1x128xf32, #tpu.memory_space<vmem>>, %arg5: memref<1x128xf32, #tpu.memory_space<vmem>>, %arg6: memref<16x128xbf16, #tpu.memory_space<vmem>>) attributes {dimension_semantics = [#tpu.dimension_semantics<parallel>], iteration_bounds = array<i64: 1>, scalar_prefetch = 0 : i64, scratch_operands = 0 : i64, tpu.core_type = #tpu.core_type<tc>, window_params = [{transform_indices = @transform_0, window_bounds = array<i64: 16, 128>}, {pipeline_mode = #tpu.pipeline_mode<synchronous>, transform_indices = @transform_1, window_bounds = array<i64: 2, 128, 128>}, {pipeline_mode = #tpu.pipeline_mode<synchronous>, transform_indices = @transform_2, window_bounds = array<i64: 2, 1, 128>}, {pipeline_mode = #tpu.pipeline_mode<synchronous>, transform_indices = @transform_3, window_bounds = array<i64: 1, 128>}, {pipeline_mode = #tpu.pipeline_mode<synchronous>, transform_indices = @transform_4, window_bounds = array<i64: 1, 128>}, {transform_indices = @transform_5, window_bounds = array<i64: 16, 128>}]} {
    %c0 = arith.constant 0 : index
    %c0_0 = arith.constant 0 : index
    %0 = vector.load %arg1[%c0, %c0_0] : memref<16x128xbf16, #tpu.memory_space<vmem>>, vector<16x128xbf16>
    %1 = arith.extf %0 : vector<16x128xbf16> to vector<16x128xf32>
    %2 = arith.truncf %1 : vector<16x128xf32> to vector<16x128xbf16>
    %c0_1 = arith.constant 0 : index
    %c0_2 = arith.constant 0 : index
    %c0_3 = arith.constant 0 : index
    %3 = vector.load %arg2[%c0_1, %c0_2, %c0_3] : memref<2x128x128xbf16, #tpu.memory_space<vmem>>, vector<1x128x128xbf16>
    %4 = vector.shape_cast %3 : vector<1x128x128xbf16> to vector<128x128xbf16>
    %cst = arith.constant dense<0.000000e+00> : vector<16x128xf32>
    %5 = tpu.matmul %2, %4, %cst {dimension_numbers = #tpu.dot_dimension_numbers<[1], [0], [0], [1], [0, 0, 1, 1], [], []>} : vector<16x128xbf16>, vector<128x128xbf16>, vector<16x128xf32> -> vector<16x128xf32>
    %c0_4 = arith.constant 0 : index
    %c0_5 = arith.constant 0 : index
    %c0_6 = arith.constant 0 : index
    %6 = vector.load %arg3[%c0_4, %c0_5, %c0_6] : memref<2x1x128xf32, #tpu.memory_space<vmem>>, vector<1x1x128xf32>
    %7 = vector.shape_cast %6 : vector<1x1x128xf32> to vector<1x128xf32>
    %8 = vector.broadcast %7 : vector<1x128xf32> to vector<16x128xf32>
    %9 = arith.addf %5, %8 : vector<16x128xf32>
    %cst_7 = arith.constant 0.000000e+00 : f32
    %10 = vector.broadcast %cst_7 : f32 to vector<16x128xf32>
    %11 = arith.maximumf %9, %10 : vector<16x128xf32>
    %12 = arith.addf %1, %11 : vector<16x128xf32>
    %13 = arith.truncf %12 : vector<16x128xf32> to vector<16x128xbf16>
    %c1 = arith.constant 1 : index
    %c0_8 = arith.constant 0 : index
    %c0_9 = arith.constant 0 : index
    %14 = vector.load %arg2[%c1, %c0_8, %c0_9] : memref<2x128x128xbf16, #tpu.memory_space<vmem>>, vector<1x128x128xbf16>
    %15 = vector.shape_cast %14 : vector<1x128x128xbf16> to vector<128x128xbf16>
    %cst_10 = arith.constant dense<0.000000e+00> : vector<16x128xf32>
    %16 = tpu.matmul %13, %15, %cst_10 {dimension_numbers = #tpu.dot_dimension_numbers<[1], [0], [0], [1], [0, 0, 1, 1], [], []>} : vector<16x128xbf16>, vector<128x128xbf16>, vector<16x128xf32> -> vector<16x128xf32>
    %c1_11 = arith.constant 1 : index
    %c0_12 = arith.constant 0 : index
    %c0_13 = arith.constant 0 : index
    %17 = vector.load %arg3[%c1_11, %c0_12, %c0_13] : memref<2x1x128xf32, #tpu.memory_space<vmem>>, vector<1x1x128xf32>
    %18 = vector.shape_cast %17 : vector<1x1x128xf32> to vector<1x128xf32>
    %19 = vector.broadcast %18 : vector<1x128xf32> to vector<16x128xf32>
    %20 = arith.addf %16, %19 : vector<16x128xf32>
    %cst_14 = arith.constant 0.000000e+00 : f32
    %21 = vector.broadcast %cst_14 : f32 to vector<16x128xf32>
    %22 = arith.maximumf %20, %21 : vector<16x128xf32>
    %23 = arith.addf %12, %22 : vector<16x128xf32>
    %c0_15 = arith.constant 0 : index
    %c0_16 = arith.constant 0 : index
    %24 = vector.load %arg4[%c0_15, %c0_16] : memref<1x128xf32, #tpu.memory_space<vmem>>, vector<1x128xf32>
    %c0_17 = arith.constant 0 : index
    %c0_18 = arith.constant 0 : index
    %25 = vector.load %arg5[%c0_17, %c0_18] : memref<1x128xf32, #tpu.memory_space<vmem>>, vector<1x128xf32>
    %cst_19 = arith.constant dense<0.000000e+00> : vector<16xf32>
    %26 = vector.multi_reduction <add>, %23, %cst_19 [1] : vector<16x128xf32> to vector<16xf32>
    %27 = vector.shape_cast %26 : vector<16xf32> to vector<16x1xf32>
    %cst_20 = arith.constant 7.812500e-03 : f32
    %28 = vector.broadcast %cst_20 : f32 to vector<16x1xf32>
    %29 = arith.mulf %27, %28 : vector<16x1xf32>
    %30 = vector.broadcast %29 : vector<16x1xf32> to vector<16x128xf32>
    %31 = arith.subf %23, %30 : vector<16x128xf32>
    %32 = arith.mulf %31, %31 : vector<16x128xf32>
    %cst_21 = arith.constant dense<0.000000e+00> : vector<16xf32>
    %33 = vector.multi_reduction <add>, %32, %cst_21 [1] : vector<16x128xf32> to vector<16xf32>
    %34 = vector.shape_cast %33 : vector<16xf32> to vector<16x1xf32>
    %cst_22 = arith.constant 7.812500e-03 : f32
    %35 = vector.broadcast %cst_22 : f32 to vector<16x1xf32>
    %36 = arith.mulf %34, %35 : vector<16x1xf32>
    %cst_23 = arith.constant 9.99999974E-6 : f32
    %37 = vector.broadcast %cst_23 : f32 to vector<16x1xf32>
    %38 = arith.addf %36, %37 : vector<16x1xf32>
    %39 = math.rsqrt %38 : vector<16x1xf32>
    %40 = vector.broadcast %39 : vector<16x1xf32> to vector<16x128xf32>
    %41 = arith.mulf %31, %40 : vector<16x128xf32>
    %42 = vector.broadcast %24 : vector<1x128xf32> to vector<16x128xf32>
    %43 = arith.mulf %41, %42 : vector<16x128xf32>
    %44 = vector.broadcast %25 : vector<1x128xf32> to vector<16x128xf32>
    %45 = arith.addf %43, %44 : vector<16x128xf32>
    %46 = arith.truncf %45 : vector<16x128xf32> to vector<16x128xbf16>
    %c0_24 = arith.constant 0 : index
    %c0_25 = arith.constant 0 : index
    %47 = vector.load %arg6[%c0_24, %c0_25] : memref<16x128xbf16, #tpu.memory_space<vmem>>, vector<16x128xbf16>
    tpu.vector_store %arg6[%c0_24, %c0_25], %46 {strides = array<i32>} : memref<16x128xbf16, #tpu.memory_space<vmem>>, vector<16x128xbf16>,
    return
  }
  func.func @transform_0(%arg0: i32) -> (i32, i32) {
    %c0_i32 = arith.constant 0 : i32
    %c0_i32_0 = arith.constant 0 : i32
    return %arg0, %c0_i32 : i32, i32
  }
  func.func @transform_1(%arg0: i32) -> (i32, i32, i32) {
    %c0_i32 = arith.constant 0 : i32
    %c0_i32_0 = arith.constant 0 : i32
    %c0_i32_1 = arith.constant 0 : i32
    %c0_i32_2 = arith.constant 0 : i32
    return %c0_i32, %c0_i32_0, %c0_i32_1 : i32, i32, i32
  }
  func.func @transform_2(%arg0: i32) -> (i32, i32, i32) {
    %c0_i32 = arith.constant 0 : i32
    %c0_i32_0 = arith.constant 0 : i32
    %c0_i32_1 = arith.constant 0 : i32
    %c0_i32_2 = arith.constant 0 : i32
    return %c0_i32, %c0_i32_0, %c0_i32_1 : i32, i32, i32
  }
  func.func @transform_3(%arg0: i32) -> (i32, i32) {
    %c0_i32 = arith.constant 0 : i32
    %c0_i32_0 = arith.constant 0 : i32
    %c0_i32_1 = arith.constant 0 : i32
    return %c0_i32, %c0_i32_0 : i32, i32
  }
  func.func @transform_4(%arg0: i32) -> (i32, i32) {
    %c0_i32 = arith.constant 0 : i32
    %c0_i32_0 = arith.constant 0 : i32
    %c0_i32_1 = arith.constant 0 : i32
    return %c0_i32, %c0_i32_0 : i32, i32
  }
  func.func @transform_5(%arg0: i32) -> (i32, i32) {
    %c0_i32 = arith.constant 0 : i32
    %c0_i32_0 = arith.constant 0 : i32
    return %arg0, %c0_i32 : i32, i32
  }
}

</mosaic_0001>

<bundles_post_ra>
// kernel: tpu_custom_call.1
= control target key start
LH: loop header
LB: loop body
LE: loop exit
PB: predicated region body
PF: predicated region fallthrough
CT: control target
= control target key end

     0   :  { %10 = vsyncpa [#allocation3], 0  ;;  %s602_s0 = inlined_call_operand.hbm [shape: bf16[16,128], index: 0, kind: input, shape index: {}]   ;;  %s603_s1 = inlined_call_operand.hbm [shape: bf16[2,128,128], index: 1, kind: input, shape index: {}]   ;;  %s604_s2 = inlined_call_operand.hbm [shape: f32[2,1,128], index: 2, kind: input, shape index: {}]   ;;  %s605_s3 = inlined_call_operand.vmem [shape: f32[1,128], index: 3, kind: input, shape index: {}]   ;;  %s606_s4 = inlined_call_operand.vmem [shape: f32[1,128], index: 4, kind: input, shape index: {}]   ;;  %s607_s5 = inlined_call_operand.hbm [shape: bf16[16,128], index: 5, kind: output, shape index: {}]  }
   0x1   :  { %11 = vsyncpa [#allocation6], 0 }
   0x2   :  { %12 = vsyncpa [#allocation4], 0  ;;  %s30_s20 = sshll.u32 %s603_s1, 4  ;;  %s537_s21 = smov [#allocation5]   ;;  %s31_s20 = int_to_ptr.hbm [resolvable:$true] %s30_s20 }
   0x3   :  { %s32_s22 = sshll.u32 %s537_s21, 4  ;;  %s17_s25 = sshll.u32 %s602_s0, 4  ;;  %s33_s22 = int_to_ptr.vmem [resolvable:$true] %s32_s22  ;;  %s18_s25 = int_to_ptr.hbm [resolvable:$true] %s17_s25 }
   0x4   :  { %s538_s26 = smov 64   ;;  %s539_s27 = smov 4  }
   0x5   :  { %38 = dma.hbm_to_vmem [thread:$0]  %s31_s20, 2048, %s33_s22, [#allocation6], %s538_s26, %s538_s26, %s539_s27  }
   0x6   :  { %s540_s28 = smov [#allocation2]   ;;  %s43_s1 = sshll.u32 %s604_s2, 4  ;;  %s44_s1 = int_to_ptr.hbm [resolvable:$true] %s43_s1 }
   0x7   :  { %s19_s29 = sshll.u32 %s540_s28, 4  ;;  %s541_s0 = smov [#allocation7]   ;;  %s20_s29 = int_to_ptr.vmem [resolvable:$true] %s19_s29 }
   0x8   :  { %25 = dma.hbm_to_vmem [thread:$0]  %s18_s25, 128, %s20_s29, [#allocation3], %s538_s26, %s538_s26, %s539_s27  }
   0x9   :  { %s45_s7 = sshll.u32 %s541_s0, 4  ;;  %s542_s8 = smov 16   ;;  %s46_s7 = int_to_ptr.vmem [resolvable:$true] %s45_s7 }
   0xa   :  { %s543_s9 = smov 1  }
   0xb   :  { %51 = dma.hbm_to_vmem [thread:$0]  %s44_s1, 32, %s46_s7, [#allocation6], %s542_s8, %s542_s8, %s543_s9  }
   0xc   :  { %531 = dma.done.wait [#allocation3], 128  }
   0xd   :  { %532 = vsyncadd [#allocation3], 4294967168 }
   0xe   :  { %533 = dma.done.wait [#allocation6], 2080  }
   0xf   :  { %534 = vsyncadd [#allocation6], 4294965216  ;;  %v405_v0 = vld [vmem:[#allocation5 + $0x38] sm:$0xff]  ;;  %v404_v1 = vld [vmem:[#allocation5 + $0x30] sm:$0xff]  ;;  %s544_s13 = smov [#allocation8]   ;;  %s315_s17 = sshll.u32 %s607_s5, 4  ;;  %s316_s17 = int_to_ptr.hbm [resolvable:$true] %s315_s17 }
  0x10   :  { %146 = vmatpush.bf16.msra.mxu0 %v405_v0  ;;  %v413_v2 = vld [vmem:[#allocation5 + $0x78] sm:$0xff]  ;;  %v412_v3 = vld [vmem:[#allocation5 + $0x70] sm:$0xff]  ;;  %v403_v4 = vld [vmem:[#allocation5 + $0x28] sm:$0xff]  ;;  %s313_s14 = sshll.u32 %s544_s13, 4  ;;  %s314_s14 = int_to_ptr.vmem [resolvable:$true] %s313_s14 }
  0x11   :  { %235 = vmatpush.bf16.msra.mxu1 %v413_v2  ;;  %v411_v5 = vld [vmem:[#allocation5 + $0x68] sm:$0xff]  ;;  %v402_v6 = vld [vmem:[#allocation5 + $0x20] sm:$0xff]  ;;  %v401_v8 = vld [vmem:[#allocation5 + $0x18] sm:$0xff] }
  0x12   :  { %v410_v7 = vld [vmem:[#allocation5 + $0x60] sm:$0xff]  ;;  %v400_v9 = vld [vmem:[#allocation5 + $0x10] sm:$0xff]  ;;  %v399_v10 = vld [vmem:[#allocation5 + $0x8] sm:$0xff] }
  0x13   :  { %v398_v11 = vld [vmem:[#allocation5] sm:$0xff]  ;;  %v397_v12 = vld [vmem:[#allocation2] sm:$0xff]  ;;  %v408_v14 = vld [vmem:[#allocation5 + $0x50] sm:$0xff] }
  0x14   :  { %147 = vmatpush.bf16.msra.mxu0 %v404_v1  ;;  %v409_v13 = vld [vmem:[#allocation5 + $0x58] sm:$0xff]  ;;  %v407_v15 = vld [vmem:[#allocation5 + $0x48] sm:$0xff]  ;;  %v406_v16 = vld [vmem:[#allocation5 + $0x40] sm:$0xff] }
  0x15   :  { %236 = vmatpush.bf16.msra.mxu1 %v412_v3  ;;  %v427_v18 = vld [vmem:[#allocation7] ss:$0 sm:$0xff]  ;;  %v68_v20 = vld [vmem:[#allocation2] sm:$0xff]   ;;  %v428_v30 = vld [vmem:[#allocation7 + $0x1] ss:$0 sm:$0xff] }
  0x16   :  { %v70_v22 = vunpack.c.l.bf16 %v68_v20  ;;  %v71_v24 = vunpack.c.h.bf16 %v68_v20  ;;  %v429_v2 = vld [vmem:[%s605_s3] ss:$0 sm:$0xff] }
  0x18   :  { %148 = vmatpush.bf16.msra.mxu0 %v403_v4 }
  0x19   :  { %237 = vmatpush.bf16.msra.mxu1 %v411_v5 }
  0x1c   :  { %149 = vmatpush.bf16.msra.mxu0 %v402_v6 }
  0x1d   :  { %238 = vmatpush.bf16.msra.mxu1 %v410_v7  ;;  %v430_v7 = vld [vmem:[%s606_s4] ss:$0 sm:$0xff] }
  0x20   :  { %150 = vmatpush.bf16.msra.mxu0 %v401_v8 }
  0x21   :  { %239 = vmatpush.bf16.msra.mxu1 %v409_v13 }
  0x24   :  { %151 = vmatpush.bf16.msra.mxu0 %v400_v9 }
  0x25   :  { %240 = vmatpush.bf16.msra.mxu1 %v408_v14 }
  0x28   :  { %152 = vmatpush.bf16.msra.mxu0 %v399_v10 }
  0x29   :  { %241 = vmatpush.bf16.msra.mxu1 %v407_v15 }
  0x2c   :  { %153 = vmatpush.bf16.msra.mxu0 %v398_v11 }
  0x2d   :  { %242 = vmatpush.bf16.msra.mxu1 %v406_v16 }
  0x2f   :  { %154 = vmatmul.bf16.vlgmr.msra.gmra.mxu0 %v397_v12 }
  0xac   :  { %v155_v17 = vpop.f32.mrf.mxu0 }
  0xad   :  { %v156_v19 = vadd.f32 %v427_v18, %v155_v17 }
  0xaf   :  { %v160_v23 = vmax.f32 %v156_v19, 0.0 }
  0xb1   :  { %v162_v27 = vadd.f32 %v160_v23, %v70_v22 }
  0xb4   :  { %v157_v21 = vpop.f32.mrf.mxu0 }
  0xb5   :  { %v158_v25 = vadd.f32 %v427_v18, %v157_v21 }
  0xb7   :  { %v161_v26 = vmax.f32 %v158_v25, 0.0 }
  0xb9   :  { %v163_v28 = vadd.f32 %v161_v26, %v71_v24 }
  0xbb   :  { %v164_v29 = vpack.c.bf16 %v163_v28, %v162_v27 }
  0xbd   :  { %243 = vmatmul.bf16.vlgmr.msra.gmra.mxu1 %v164_v29 }
 0x13a   :  { %v244_v31 = vpop.f32.mrf.mxu1 }
 0x13b   :  { %v245_v32 = vadd.f32 %v428_v30, %v244_v31 }
 0x13d   :  { %v249_v33 = vmax.f32 %v245_v32, 0.0 }
 0x13f   :  { %v251_v34 = vadd.f32 %v249_v33, %v162_v27 }
 0x141   :  { %255 = vadd.xlane.f32.xlu0 %v251_v34 }
 0x142   :  { %v246_v35 = vpop.f32.mrf.mxu1 }
 0x143   :  { %v247_v36 = vadd.f32 %v428_v30, %v246_v35 }
 0x145   :  { %v250_v37 = vmax.f32 %v247_v36, 0.0 }
 0x147   :  { %v252_v38 = vadd.f32 %v250_v37, %v163_v28 }
 0x149   :  { %257 = vadd.xlane.f32.xlu0 %v252_v38 }
 0x1b4   :  { %v256_v39 = vpop.xlane.xlu0 %255 }
 0x1b5   :  { %v259_v40 = vmul.f32 0.0078125, %v256_v39 }
 0x1b7   :  { %v261_v41 = vsub.f32 %v251_v34, %v259_v40 }
 0x1b9   :  { %v263_v42 = vmul.f32 %v261_v41, %v261_v41 }
 0x1bb   :  { %265 = vadd.xlane.f32.xlu1 %v263_v42 }
 0x1bc   :  { %v258_v43 = vpop.xlane.xlu0 %257 }
 0x1bd   :  { %v260_v44 = vmul.f32 0.0078125, %v258_v43 }
 0x1bf   :  { %v262_v45 = vsub.f32 %v252_v38, %v260_v44 }
 0x1c1   :  { %v264_v46 = vmul.f32 %v262_v45, %v262_v45 }
 0x1c3   :  { %267 = vadd.xlane.f32.xlu1 %v264_v46 }
 0x22e   :  { %v266_v47 = vpop.xlane.xlu1 %265 }
 0x22f   :  { %v269_v48 = vmul.f32 0.0078125, %v266_v47 }
 0x231   :  { %v271_v49 = vadd.f32 1e-05, %v269_v48 }
 0x233   :  { %431 = vrsqrt.f32 %v271_v49  ;;  %vm279_vm1 = vweird.f32 %v271_v49 }
 0x236   :  { %v268_v50 = vpop.xlane.xlu1 %267 }
 0x237   :  { %v270_v51 = vmul.f32 0.0078125, %v268_v50 }
 0x239   :  { %v432_v52 = vpop.eup %431  ;;  %v272_v53 = vadd.f32 1e-05, %v270_v51 }
 0x23a   :  { %v274_v54 = vmul.f32 %v432_v52, %v271_v49  ;;  %vm280_vm0 = vweird.f32 %v432_v52 }
 0x23b   :  { %433 = vrsqrt.f32 %v272_v53  ;;  %vm281_vm2 = vmor %vm279_vm1, %vm280_vm0  ;;  %vm289_vm4 = vweird.f32 %v272_v53 }
 0x23c   :  { %v275_v55 = vmul.f32 %v432_v52, %v274_v54 }
 0x23e   :  { %v276_v56 = vmul.f32 0.5, %v275_v55 }
 0x240   :  { %v277_v57 = vsub.f32 1.5, %v276_v56 }
 0x241   :  { %v434_v58 = vpop.eup %433 }
 0x242   :  { %v278_v59 = vmul.f32 %v432_v52, %v277_v57  ;;  %v284_v60 = vmul.f32 %v434_v58, %v272_v53  ;;  %vm290_vm3 = vweird.f32 %v434_v58 }
 0x243   :  { %vm291_vm5 = vmor %vm289_vm4, %vm290_vm3 }
 0x244   :  { %v285_v61 = vmul.f32 %v434_v58, %v284_v60  ;;  %v282_v62 = vsel %vm281_vm2, %v432_v52, %v278_v59 }
 0x245   :  { %v293_v1 = vmul.f32 %v282_v62, %v261_v41 }
 0x246   :  { %v286_v63 = vmul.f32 0.5, %v285_v61 }
 0x247   :  { %v298_v6 = vmul.f32 %v429_v2, %v293_v1 }
 0x248   :  { %v287_v0 = vsub.f32 1.5, %v286_v63 }
 0x249   :  { %v303_v9 = vadd.f32 %v430_v7, %v298_v6 }
 0x24a   :  { %v288_v3 = vmul.f32 %v434_v58, %v287_v0 }
 0x24c   :  { %v292_v4 = vsel %vm291_vm5, %v434_v58, %v288_v3 }
 0x24d   :  { %v294_v5 = vmul.f32 %v292_v4, %v262_v45 }
 0x24f   :  { %v299_v8 = vmul.f32 %v429_v2, %v294_v5 }
 0x251   :  { %v304_v10 = vadd.f32 %v430_v7, %v299_v8 }
 0x253   :  { %v417_v11 = vpack.c.bf16 %v304_v10, %v303_v9 }
 0x255   :  { %418 = vst [vmem:[#allocation8] sm:$0xff] %v417_v11  }
 0x256   :  { %321 = dma.vmem_to_hbm [thread:$0]  %s314_s14, 128, %s316_s17, [#allocation4], %s538_s26, %s538_s26, %s539_s27  }
 0x257   :  { %535 = dma.done.wait [#allocation4], 128  }
 0x258   :  { %536 = vsyncadd [#allocation4], 4294967168 }
 0x259   :  { %326 = vsyncpa [#allocation3], 1 }
 0x25a   :  { %327 = vsyncpa [#allocation6], 1 }
 0x25b   :  { %328 = vsyncpa [#allocation4], 1 }

// kernel: tpu_custom_call.1
= control target key start
LH: loop header
LB: loop body
LE: loop exit
PB: predicated region body
PF: predicated region fallthrough
CT: control target
= control target key end

     0   :  { %10 = vsyncpa [#allocation3], 0  ;;  %s602_s0 = inlined_call_operand.hbm [shape: bf16[16,128], index: 0, kind: input, shape index: {}]   ;;  %s603_s1 = inlined_call_operand.hbm [shape: bf16[2,128,128], index: 1, kind: input, shape index: {}]   ;;  %s604_s2 = inlined_call_operand.hbm [shape: f32[2,1,128], index: 2, kind: input, shape index: {}]   ;;  %s605_s3 = inlined_call_operand.vmem [shape: f32[1,128], index: 3, kind: input, shape index: {}]   ;;  %s606_s4 = inlined_call_operand.vmem [shape: f32[1,128], index: 4, kind: input, shape index: {}]   ;;  %s607_s5 = inlined_call_operand.hbm [shape: bf16[16,128], index: 5, kind: output, shape index: {}]  }
   0x1   :  { %11 = vsyncpa [#allocation6], 0 }
   0x2   :  { %12 = vsyncpa [#allocation4], 0  ;;  %s30_s20 = sshll.u32 %s603_s1, 4  ;;  %s537_s21 = smov [#allocation5]   ;;  %s31_s20 = int_to_ptr.hbm [resolvable:$true] %s30_s20 }
   0x3   :  { %s32_s22 = sshll.u32 %s537_s21, 4  ;;  %s17_s25 = sshll.u32 %s602_s0, 4  ;;  %s33_s22 = int_to_ptr.vmem [resolvable:$true] %s32_s22  ;;  %s18_s25 = int_to_ptr.hbm [resolvable:$true] %s17_s25 }
   0x4   :  { %s538_s26 = smov 64   ;;  %s539_s27 = smov 4  }
   0x5   :  { %38 = dma.hbm_to_vmem [thread:$0]  %s31_s20, 2048, %s33_s22, [#allocation6], %s538_s26, %s538_s26, %s539_s27  }
   0x6   :  { %s540_s28 = smov [#allocation2]   ;;  %s43_s1 = sshll.u32 %s604_s2, 4  ;;  %s44_s1 = int_to_ptr.hbm [resolvable:$true] %s43_s1 }
   0x7   :  { %s19_s29 = sshll.u32 %s540_s28, 4  ;;  %s541_s0 = smov [#allocation7]   ;;  %s20_s29 = int_to_ptr.vmem [resolvable:$true] %s19_s29 }
   0x8   :  { %25 = dma.hbm_to_vmem [thread:$0]  %s18_s25, 128, %s20_s29, [#allocation3], %s538_s26, %s538_s26, %s539_s27  }
   0x9   :  { %s45_s7 = sshll.u32 %s541_s0, 4  ;;  %s542_s8 = smov 16   ;;  %s46_s7 = int_to_ptr.vmem [resolvable:$true] %s45_s7 }
   0xa   :  { %s543_s9 = smov 1  }
   0xb   :  { %51 = dma.hbm_to_vmem [thread:$0]  %s44_s1, 32, %s46_s7, [#allocation6], %s542_s8, %s542_s8, %s543_s9  }
   0xc   :  { %531 = dma.done.wait [#allocation3], 128  }
   0xd   :  { %532 = vsyncadd [#allocation3], 4294967168 }
   0xe   :  { %533 = dma.done.wait [#allocation6], 2080  }
   0xf   :  { %534 = vsyncadd [#allocation6], 4294965216  ;;  %v405_v0 = vld [vmem:[#allocation5 + $0x38] sm:$0xff]  ;;  %v404_v1 = vld [vmem:[#allocation5 + $0x30] sm:$0xff]  ;;  %s544_s13 = smov [#allocation8]   ;;  %s315_s17 = sshll.u32 %s607_s5, 4  ;;  %s316_s17 = int_to_ptr.hbm [resolvable:$true] %s315_s17 }
  0x10   :  { %146 = vmatpush.bf16.msra.mxu0 %v405_v0  ;;  %v413_v2 = vld [vmem:[#allocation5 + $0x78] sm:$0xff]  ;;  %v412_v3 = vld [vmem:[#allocation5 + $0x70] sm:$0xff]  ;;  %v403_v4 = vld [vmem:[#allocation5 + $0x28] sm:$0xff]  ;;  %s313_s14 = sshll.u32 %s544_s13, 4  ;;  %s314_s14 = int_to_ptr.vmem [resolvable:$true] %s313_s14 }
  0x11   :  { %235 = vmatpush.bf16.msra.mxu1 %v413_v2  ;;  %v411_v5 = vld [vmem:[#allocation5 + $0x68] sm:$0xff]  ;;  %v402_v6 = vld [vmem:[#allocation5 + $0x20] sm:$0xff]  ;;  %v401_v8 = vld [vmem:[#allocation5 + $0x18] sm:$0xff] }
  0x12   :  { %v410_v7 = vld [vmem:[#allocation5 + $0x60] sm:$0xff]  ;;  %v400_v9 = vld [vmem:[#allocation5 + $0x10] sm:$0xff]  ;;  %v399_v10 = vld [vmem:[#allocation5 + $0x8] sm:$0xff] }
  0x13   :  { %v398_v11 = vld [vmem:[#allocation5] sm:$0xff]  ;;  %v397_v12 = vld [vmem:[#allocation2] sm:$0xff]  ;;  %v408_v14 = vld [vmem:[#allocation5 + $0x50] sm:$0xff] }
  0x14   :  { %147 = vmatpush.bf16.msra.mxu0 %v404_v1  ;;  %v409_v13 = vld [vmem:[#allocation5 + $0x58] sm:$0xff]  ;;  %v407_v15 = vld [vmem:[#allocation5 + $0x48] sm:$0xff]  ;;  %v406_v16 = vld [vmem:[#allocation5 + $0x40] sm:$0xff] }
  0x15   :  { %236 = vmatpush.bf16.msra.mxu1 %v412_v3  ;;  %v427_v18 = vld [vmem:[#allocation7] ss:$0 sm:$0xff]  ;;  %v68_v20 = vld [vmem:[#allocation2] sm:$0xff]   ;;  %v428_v30 = vld [vmem:[#allocation7 + $0x1] ss:$0 sm:$0xff] }
  0x16   :  { %v70_v22 = vunpack.c.l.bf16 %v68_v20  ;;  %v71_v24 = vunpack.c.h.bf16 %v68_v20  ;;  %v429_v2 = vld [vmem:[%s605_s3] ss:$0 sm:$0xff] }
  0x18   :  { %148 = vmatpush.bf16.msra.mxu0 %v403_v4 }
  0x19   :  { %237 = vmatpush.bf16.msra.mxu1 %v411_v5 }
  0x1c   :  { %149 = vmatpush.bf16.msra.mxu0 %v402_v6 }
  0x1d   :  { %238 = vmatpush.bf16.msra.mxu1 %v410_v7  ;;  %v430_v7 = vld [vmem:[%s606_s4] ss:$0 sm:$0xff] }
  0x20   :  { %150 = vmatpush.bf16.msra.mxu0 %v401_v8 }
  0x21   :  { %239 = vmatpush.bf16.msra.mxu1 %v409_v13 }
  0x24   :  { %151 = vmatpush.bf16.msra.mxu0 %v400_v9 }
  0x25   :  { %240 = vmatpush.bf16.msra.mxu1 %v408_v14 }
  0x28   :  { %152 = vmatpush.bf16.msra.mxu0 %v399_v10 }
  0x29   :  { %241 = vmatpush.bf16.msra.mxu1 %v407_v15 }
  0x2c   :  { %153 = vmatpush.bf16.msra.mxu0 %v398_v11 }
  0x2d   :  { %242 = vmatpush.bf16.msra.mxu1 %v406_v16 }
  0x2f   :  { %154 = vmatmul.bf16.vlgmr.msra.gmra.mxu0 %v397_v12 }
  0xac   :  { %v155_v17 = vpop.f32.mrf.mxu0 }
  0xad   :  { %v156_v19 = vadd.f32 %v427_v18, %v155_v17 }
  0xaf   :  { %v160_v23 = vmax.f32 %v156_v19, 0.0 }
  0xb1   :  { %v162_v27 = vadd.f32 %v160_v23, %v70_v22 }
  0xb4   :  { %v157_v21 = vpop.f32.mrf.mxu0 }
  0xb5   :  { %v158_v25 = vadd.f32 %v427_v18, %v157_v21 }
  0xb7   :  { %v161_v26 = vmax.f32 %v158_v25, 0.0 }
  0xb9   :  { %v163_v28 = vadd.f32 %v161_v26, %v71_v24 }
  0xbb   :  { %v164_v29 = vpack.c.bf16 %v163_v28, %v162_v27 }
  0xbd   :  { %243 = vmatmul.bf16.vlgmr.msra.gmra.mxu1 %v164_v29 }
 0x13a   :  { %v244_v31 = vpop.f32.mrf.mxu1 }
 0x13b   :  { %v245_v32 = vadd.f32 %v428_v30, %v244_v31 }
 0x13d   :  { %v249_v33 = vmax.f32 %v245_v32, 0.0 }
 0x13f   :  { %v251_v34 = vadd.f32 %v249_v33, %v162_v27 }
 0x141   :  { %255 = vadd.xlane.f32.xlu0 %v251_v34 }
 0x142   :  { %v246_v35 = vpop.f32.mrf.mxu1 }
 0x143   :  { %v247_v36 = vadd.f32 %v428_v30, %v246_v35 }
 0x145   :  { %v250_v37 = vmax.f32 %v247_v36, 0.0 }
 0x147   :  { %v252_v38 = vadd.f32 %v250_v37, %v163_v28 }
 0x149   :  { %257 = vadd.xlane.f32.xlu0 %v252_v38 }
 0x1b4   :  { %v256_v39 = vpop.xlane.xlu0 %255 }
 0x1b5   :  { %v259_v40 = vmul.f32 0.0078125, %v256_v39 }
 0x1b7   :  { %v261_v41 = vsub.f32 %v251_v34, %v259_v40 }
 0x1b9   :  { %v263_v42 = vmul.f32 %v261_v41, %v261_v41 }
 0x1bb   :  { %265 = vadd.xlane.f32.xlu1 %v263_v42 }
 0x1bc   :  { %v258_v43 = vpop.xlane.xlu0 %257 }
 0x1bd   :  { %v260_v44 = vmul.f32 0.0078125, %v258_v43 }
 0x1bf   :  { %v262_v45 = vsub.f32 %v252_v38, %v260_v44 }
 0x1c1   :  { %v264_v46 = vmul.f32 %v262_v45, %v262_v45 }
 0x1c3   :  { %267 = vadd.xlane.f32.xlu1 %v264_v46 }
 0x22e   :  { %v266_v47 = vpop.xlane.xlu1 %265 }
 0x22f   :  { %v269_v48 = vmul.f32 0.0078125, %v266_v47 }
 0x231   :  { %v271_v49 = vadd.f32 1e-05, %v269_v48 }
 0x233   :  { %431 = vrsqrt.f32 %v271_v49  ;;  %vm279_vm1 = vweird.f32 %v271_v49 }
 0x236   :  { %v268_v50 = vpop.xlane.xlu1 %267 }
 0x237   :  { %v270_v51 = vmul.f32 0.0078125, %v268_v50 }
 0x239   :  { %v432_v52 = vpop.eup %431  ;;  %v272_v53 = vadd.f32 1e-05, %v270_v51 }
 0x23a   :  { %v274_v54 = vmul.f32 %v432_v52, %v271_v49  ;;  %vm280_vm0 = vweird.f32 %v432_v52 }
 0x23b   :  { %433 = vrsqrt.f32 %v272_v53  ;;  %vm281_vm2 = vmor %vm279_vm1, %vm280_vm0  ;;  %vm289_vm4 = vweird.f32 %v272_v53 }
 0x23c   :  { %v275_v55 = vmul.f32 %v432_v52, %v274_v54 }
 0x23e   :  { %v276_v56 = vmul.f32 0.5, %v275_v55 }
 0x240   :  { %v277_v57 = vsub.f32 1.5, %v276_v56 }
 0x241   :  { %v434_v58 = vpop.eup %433 }
 0x242   :  { %v278_v59 = vmul.f32 %v432_v52, %v277_v57  ;;  %v284_v60 = vmul.f32 %v434_v58, %v272_v53  ;;  %vm290_vm3 = vweird.f32 %v434_v58 }
 0x243   :  { %vm291_vm5 = vmor %vm289_vm4, %vm290_vm3 }
 0x244   :  { %v285_v61 = vmul.f32 %v434_v58, %v284_v60  ;;  %v282_v62 = vsel %vm281_vm2, %v432_v52, %v278_v59 }
 0x245   :  { %v293_v1 = vmul.f32 %v282_v62, %v261_v41 }
 0x246   :  { %v286_v63 = vmul.f32 0.5, %v285_v61 }
 0x247   :  { %v298_v6 = vmul.f32 %v429_v2, %v293_v1 }
 0x248   :  { %v287_v0 = vsub.f32 1.5, %v286_v63 }
 0x249   :  { %v303_v9 = vadd.f32 %v430_v7, %v298_v6 }
 0x24a   :  { %v288_v3 = vmul.f32 %v434_v58, %v287_v0 }
 0x24c   :  { %v292_v4 = vsel %vm291_vm5, %v434_v58, %v288_v3 }
 0x24d   :  { %v294_v5 = vmul.f32 %v292_v4, %v262_v45 }
 0x24f   :  { %v299_v8 = vmul.f32 %v429_v2, %v294_v5 }
 0x251   :  { %v304_v10 = vadd.f32 %v430_v7, %v299_v8 }
 0x253   :  { %v417_v11 = vpack.c.bf16 %v304_v10, %v303_v9 }
 0x255   :  { %418 = vst [vmem:[#allocation8] sm:$0xff] %v417_v11  }
 0x256   :  { %321 = dma.vmem_to_hbm [thread:$0]  %s314_s14, 128, %s316_s17, [#allocation4], %s538_s26, %s538_s26, %s539_s27  }
 0x257   :  { %535 = dma.done.wait [#allocation4], 128  }
 0x258   :  { %536 = vsyncadd [#allocation4], 4294967168 }
 0x259   :  { %326 = vsyncpa [#allocation3], 1 }
 0x25a   :  { %327 = vsyncpa [#allocation6], 1 }
 0x25b   :  { %328 = vsyncpa [#allocation4], 1 }

</bundles_post_ra>
